<compile_context>
chip_gen: v5e
topology: v5e:2x2
jax: 0.10.0
libtpu: 0.0.40
codegen_flags: <defaults>
</compile_context>

<pallas_src>
import functools
import math

import numpy as np
import jax
import jax.numpy as jnp
from jax import lax
from jax.experimental import pallas as pl
from jax.experimental.pallas import tpu as pltpu

LOG_2PI = math.log(2.0 * math.pi)
LANES = 128


def _round_up(n, m):
    return ((n + m - 1) // m) * m


# ---------------------------------------------------------------------------
# Kernel
# ---------------------------------------------------------------------------
def a2c_kernel(x_ref, w_ref, b_ref, eps_ref, s_ref, out_ref, *, dim_output, pack):
    """One batch tile of the fused A2C_continuous forward.

    Packed column layout (d = dim_output, 6d+1 <= pack, pack % 128 == 0):
      [0, d)        : a        (matmul column holds mu)
      [d, 2d)       : log_prob (matmul column holds sd)
      [2d, 3d)      : entropy  (matmul column holds sd)
      [3d]          : v
      [3d+1, 4d+1)  : mu  (passthrough)
      [4d+1, 5d+1)  : sd  (passthrough)
      [5d+1, pack)  : zeros (weight/bias columns are zero)
    """
    d = dim_output

    # Single fused matmul (i2h folded into the packed heads), f32 accumulation.
    p = jnp.dot(x_ref[...], w_ref[...],
                preferred_element_type=jnp.float32) + b_ref[...]

    # Scatter natural-width eps into columns [0,d) (for a) and [d,2d) (for
    # log_prob) with a tiny matmul against a constant 0/1 selection matrix.
    # Every other column of `e` is exactly zero, so `a_full` below doubles as
    # the passthrough value for the v / mu / sd / zero columns.
    e = jnp.dot(eps_ref[...], s_ref[...], preferred_element_type=jnp.float32)

    # Bring sd (packed at [d,2d)) under the a-columns [0,d).  The symmetric
    # two-roll sum is independent of pltpu.roll's rotation direction because
    # the d columns "on the other side" ([pack-d, pack)) are guaranteed zeros.
    s = pltpu.roll(p, d, 1) + pltpu.roll(p, pack - d, 1)

    col = lax.broadcasted_iota(jnp.int32, (1, pack), 1)
    is_sd_col = (col >= d) & (col < 3 * d)

    # Guard the log on non-sd lanes (mu / v / zero columns could otherwise
    # produce NaN/-Inf that leaks through jnp.where under differentiation).
    log_sd = jnp.log(jnp.where(is_sd_col, p, 1.0))

    a_full = p + s * e                                    # mu + sd*eps; == p where e == 0
    logp_full = -0.5 * (e * e) - log_sd - 0.5 * LOG_2PI   # exact for a = mu + sd*eps
    ent_full = 0.5 + 0.5 * (LOG_2PI + log_sd)             # gaussian entropy

    out = jnp.where(col < d, a_full,
          jnp.where(col < 2 * d, logp_full,
          jnp.where(col < 3 * d, ent_full, a_full)))

    out_ref[...] = out.astype(out_ref.dtype)


# ---------------------------------------------------------------------------
# Wrapper
# ---------------------------------------------------------------------------
def _fold_params(params, io_dtype):
    """Pack the 3 heads column-wise and fold i2h through them (no nonlinearity)."""
    w_i2h, b_i2h = params["w_i2h"], params["b_i2h"]
    w_mu, b_mu = params["w_mu"], params["b_mu"]
    w_sd, b_sd = params["w_sd"], params["b_sd"]
    w_v, b_v = params["w_v"], params["b_v"]
    H = w_i2h.shape[1]
    d = w_mu.shape[1]

    pack = _round_up(5 * d + 1, LANES)
    if pack < 6 * d + 1:        # need >= d trailing zero lanes for the two-roll trick
        pack += LANES
    padw = pack - (5 * d + 1)

    w_heads = jnp.concatenate(
        [w_mu, w_sd, w_sd, w_v, w_mu, w_sd, jnp.zeros((H, padw), jnp.float32)], axis=1)
    b_heads = jnp.concatenate(
        [b_mu, b_sd, b_sd, b_v, b_mu, b_sd, jnp.zeros((1, padw), jnp.float32)], axis=1)

    hp = lax.Precision.HIGHEST
    w = jnp.dot(w_i2h, w_heads, precision=hp).astype(io_dtype)
    b = (jnp.dot(b_i2h, w_heads, precision=hp) + b_heads).astype(jnp.float32)

    # eps scatter matrix: eps[:, j] -> packed columns j and j+d.
    idx = jnp.arange(d)
    s = jnp.zeros((d, pack), jnp.float32)
    s = s.at[idx, idx].set(1.0).at[idx, idx + d].set(1.0)
    return w, b, s.astype(io_dtype), d, pack


def _slice_outputs(out_pack, batch, d):
    a_t = out_pack[:batch, 0:d]
    logp = out_pack[:batch, d:2 * d]
    ent = out_pack[:batch, 2 * d:3 * d]
    v_t = out_pack[:batch, 3 * d:3 * d + 1]
    mu_t = out_pack[:batch, 3 * d + 1:4 * d + 1]
    sd_t = out_pack[:batch, 4 * d + 1:5 * d + 1]
    return [a_t, logp, ent, v_t, [mu_t, sd_t]]


def a2c_forward(x, params, eps, *, block_b=4096, io_dtype=jnp.bfloat16):
    """Full A2C_continuous forward in one Pallas call (gridded over batch)."""
    x = jnp.asarray(x)
    eps = jnp.asarray(eps)
    B, Din = x.shape

    w, b, s, d, pack = _fold_params(params, io_dtype)
    x = x.astype(io_dtype)
    eps = eps.astype(io_dtype)
    io_bytes = np.dtype(io_dtype).itemsize
    sub = 16 if io_bytes < 4 else 8          # sublane granularity (packed dtypes: 16)

    # Batch tiling: big row tiles (amortize ~0.35us/grid-step), but keep the
    # grid at >= 2 steps when possible so ("parallel",) shards across both v7x
    # TensorCores (no effect on single-TC v5e/v6e).
    bp_min = _round_up(B, sub)
    bt = min(block_b, bp_min)
    if bp_min >= 2 * sub:
        bt = min(bt, _round_up((bp_min + 1) // 2, sub))
    bt = _round_up(bt, sub)

    # VMEM budget: double-buffered, lane-padded tiles.  Shrink bt if needed so
    # we stay well inside v7x's 64 MiB physical VMEM (v5e/v6e have 128 MiB).
    def vmem_need(btile):
        lane = lambda n: _round_up(max(n, 1), LANES)
        tiles = btile * (lane(Din) + lane(d) + lane(pack)) * io_bytes
        wgt = (Din + d) * pack * io_bytes + pack * 4
        return 2 * (tiles + wgt)

    while bt > sub and vmem_need(bt) > 48 * 2**20:
        bt = _round_up(bt // 2, sub)

    bp = _round_up(B, bt)
    if bp != B:
        x = jnp.pad(x, ((0, bp - B), (0, 0)))
        eps = jnp.pad(eps, ((0, bp - B), (0, 0)))
    num_blocks = bp // bt

    vmem_limit = int(min(64 * 2**20, max(32 * 2**20, 2 * vmem_need(bt))))

    kernel = functools.partial(a2c_kernel, dim_output=d, pack=pack)

    flops = 2 * bp * pack * (Din + d) + 12 * bp * pack
    transcendentals = bp * pack
    bytes_accessed = io_bytes * (bp * Din + bp * d + bp * pack
                                 + (Din + d) * pack) + 4 * pack

    out_pack = pl.pallas_call(
        kernel,
        out_shape=jax.ShapeDtypeStruct((bp, pack), io_dtype),
        grid_spec=pltpu.PrefetchScalarGridSpec(
            num_scalar_prefetch=0,
            grid=(num_blocks,),
            in_specs=[
                pl.BlockSpec((bt, Din), lambda i: (i, 0)),    # x tile
                pl.BlockSpec((Din, pack), lambda i: (0, 0)),  # folded weights (resident)
                pl.BlockSpec((1, pack), lambda i: (0, 0)),    # folded bias, f32 (resident)
                pl.BlockSpec((bt, d), lambda i: (i, 0)),      # eps tile (natural width)
                pl.BlockSpec((d, pack), lambda i: (0, 0)),    # eps scatter matrix (resident)
            ],
            out_specs=pl.BlockSpec((bt, pack), lambda i: (i, 0)),
        ),
        compiler_params=pltpu.CompilerParams(
            dimension_semantics=("parallel",),
            vmem_limit_bytes=vmem_limit),
        cost_estimate=pl.CostEstimate(
            flops=flops,
            transcendentals=transcendentals,
            bytes_accessed=bytes_accessed),
    )(x, w, b, eps, s)

    return _slice_outputs(out_pack, B, d)


# ---------------------------------------------------------------------------
# References & init (test-only)
# ---------------------------------------------------------------------------
def init_params(key, dim_input, dim_hidden, dim_output):
    """nn.Linear-style init; weights stored [fan_in, fan_out], biases [1, fan_out]."""
    def linear(k, fan_in, fan_out):
        kw, kb = jax.random.split(k)
        bound = 1.0 / math.sqrt(fan_in)
        w = jax.random.uniform(kw, (fan_in, fan_out), jnp.float32, -bound, bound)
        bb = jax.random.uniform(kb, (1, fan_out), jnp.float32, -bound, bound)
        return w, bb

    k1, k2, k3, k4 = jax.random.split(key, 4)
    w_i2h, b_i2h = linear(k1, dim_input, dim_hidden)
    w_mu, b_mu = linear(k2, dim_hidden, dim_output)
    w_sd, b_sd = linear(k3, dim_hidden, dim_output)
    w_v, b_v = linear(k4, dim_hidden, 1)
    return dict(w_i2h=w_i2h, b_i2h=b_i2h, w_mu=w_mu, b_mu=b_mu,
                w_sd=w_sd, b_sd=b_sd, w_v=w_v, b_v=b_v)


def reference_f32(x, params, eps):
    """Plain-JAX equivalent of the PyTorch module (reparameterized sample)."""
    hp = lax.Precision.HIGHEST
    h = jnp.dot(x, params["w_i2h"], precision=hp) + params["b_i2h"]
    mu = jnp.dot(h, params["w_mu"], precision=hp) + params["b_mu"]
    sd = jnp.dot(h, params["w_sd"], precision=hp) + params["b_sd"]
    v = jnp.dot(h, params["w_v"], precision=hp) + params["b_v"]
    a = mu + sd * eps
    logp = -((a - mu) ** 2) / (2.0 * sd * sd) - jnp.log(sd) - 0.5 * LOG_2PI
    ent = 0.5 + 0.5 * (LOG_2PI + jnp.log(sd))
    return [a, logp, ent, v, [mu, sd]]


def reference_same_path(x, params, eps, io_dtype):
    """Plain-JAX replica of exactly what the kernel computes (dtype-matched)."""
    w, b, s, d, pack = _fold_params(params, io_dtype)
    p = jnp.dot(x.astype(io_dtype), w, preferred_element_type=jnp.float32) + b
    e = jnp.dot(eps.astype(io_dtype), s, preferred_element_type=jnp.float32)
    sroll = jnp.roll(p, d, axis=1) + jnp.roll(p, pack - d, axis=1)
    col = jnp.arange(pack)[None, :]
    is_sd = (col >= d) & (col < 3 * d)
    log_sd = jnp.log(jnp.where(is_sd, p, 1.0))
    a_full = p + sroll * e
    logp_full = -0.5 * (e * e) - log_sd - 0.5 * LOG_2PI
    ent_full = 0.5 + 0.5 * (LOG_2PI + log_sd)
    out = jnp.where(col < d, a_full,
          jnp.where(col < 2 * d, logp_full,
          jnp.where(col < 3 * d, ent_full, a_full)))
    return _slice_outputs(out.astype(io_dtype), x.shape[0], d)


def _allclose(a, b, atol, rtol):
    a = jnp.asarray(a, jnp.float32)
    b = jnp.asarray(b, jnp.float32)
    both_nan = jnp.isnan(a) & jnp.isnan(b)
    ok = jnp.abs(a - b) <= atol + rtol * jnp.abs(b)
    return bool(jnp.all(ok | both_nan))


if __name__ == "__main__":
    dim_input, dim_hidden, dim_output = 16, 32, 4
    batch = 8

    key = jax.random.PRNGKey(0)
    k_params, k_x, k_eps = jax.random.split(key, 3)
    params = init_params(k_params, dim_input, dim_hidden, dim_output)
    x = jax.random.normal(k_x, (batch, dim_input), jnp.float32)
    # TODO(synk): torch's Normal.sample() RNG has no direct equivalent; the
    # sample is reparameterized with caller-supplied standard-normal eps.
    eps = jax.random.normal(k_eps, (batch, dim_output), jnp.float32)

    # --- perf-default bf16-I/O path: check against a dtype-matched reference ---
    a16, lp16, en16, v16, (mu16, sd16) = a2c_forward(x, params, eps)
    jax.block_until_ready((a16, lp16, en16, v16, mu16, sd16))
    assert a16.shape == (batch, dim_output)
    assert lp16.shape == (batch, dim_output)
    assert en16.shape == (batch, dim_output)
    assert v16.shape == (batch, 1)
    assert mu16.shape == (batch, dim_output)
    assert sd16.shape == (batch, dim_output)

    ra, rlp, ren, rv, (rmu, rsd) = reference_same_path(x, params, eps, jnp.bfloat16)
    assert _allclose(mu16, rmu, 5e-3, 5e-3)
    assert _allclose(sd16, rsd, 5e-3, 5e-3)
    assert _allclose(v16, rv, 5e-3, 5e-3)
    assert _allclose(a16, ra, 5e-3, 5e-3)
    assert _allclose(lp16, rlp, 5e-3, 5e-3)
    assert _allclose(en16, ren, 5e-3, 5e-3)

    # --- f32-I/O path: semantic parity with the PyTorch-equivalent math ---
    a32, lp32, en32, v32, (mu32, sd32) = a2c_forward(x, params, eps,
                                                     io_dtype=jnp.float32)
    jax.block_until_ready((a32, lp32, en32, v32, mu32, sd32))
    fa, flp, fen, fv, (fmu, fsd) = reference_f32(x, params, eps)
    assert _allclose(mu32, fmu, 2e-3, 2e-3)
    assert _allclose(sd32, fsd, 2e-3, 2e-3)
    assert _allclose(v32, fv, 2e-3, 2e-3)
    assert _allclose(a32, fa, 2e-3, 2e-3)
    assert _allclose(lp32, flp, 2e-3, 2e-3)
    assert _allclose(en32, fen, 2e-3, 2e-3)

    print("KERNEL_OK")
</pallas_src>

<mosaic_0001>
module attributes {stable_mosaic.version = 11 : i64} {
  func.func @a2c_kernel(%arg0: i32, %arg1: memref<16x16xbf16, #tpu.memory_space<vmem>>, %arg2: memref<16x128xbf16, #tpu.memory_space<vmem>>, %arg3: memref<1x128xf32, #tpu.memory_space<vmem>>, %arg4: memref<16x4xbf16, #tpu.memory_space<vmem>>, %arg5: memref<4x128xbf16, #tpu.memory_space<vmem>>, %arg6: memref<16x128xbf16, #tpu.memory_space<vmem>>) attributes {dimension_semantics = [#tpu.dimension_semantics<parallel>], iteration_bounds = array<i64: 1>, scalar_prefetch = 0 : i64, scratch_operands = 0 : i64, tpu.core_type = #tpu.core_type<tc>, window_params = [{transform_indices = @transform_0, window_bounds = array<i64: 16, 16>}, {pipeline_mode = #tpu.pipeline_mode<synchronous>, transform_indices = @transform_1, window_bounds = array<i64: 16, 128>}, {pipeline_mode = #tpu.pipeline_mode<synchronous>, transform_indices = @transform_2, window_bounds = array<i64: 1, 128>}, {transform_indices = @transform_3, window_bounds = array<i64: 16, 4>}, {pipeline_mode = #tpu.pipeline_mode<synchronous>, transform_indices = @transform_4, window_bounds = array<i64: 4, 128>}, {transform_indices = @transform_5, window_bounds = array<i64: 16, 128>}]} {
    %c0 = arith.constant 0 : index
    %c0_0 = arith.constant 0 : index
    %0 = vector.load %arg1[%c0, %c0_0] : memref<16x16xbf16, #tpu.memory_space<vmem>>, vector<16x16xbf16>
    %c0_1 = arith.constant 0 : index
    %c0_2 = arith.constant 0 : index
    %1 = vector.load %arg2[%c0_1, %c0_2] : memref<16x128xbf16, #tpu.memory_space<vmem>>, vector<16x128xbf16>
    %cst = arith.constant dense<0.000000e+00> : vector<16x128xf32>
    %2 = tpu.matmul %0, %1, %cst {dimension_numbers = #tpu.dot_dimension_numbers<[1], [0], [0], [1], [0, 0, 1, 1], [], []>} : vector<16x16xbf16>, vector<16x128xbf16>, vector<16x128xf32> -> vector<16x128xf32>
    %c0_3 = arith.constant 0 : index
    %c0_4 = arith.constant 0 : index
    %3 = vector.load %arg3[%c0_3, %c0_4] : memref<1x128xf32, #tpu.memory_space<vmem>>, vector<1x128xf32>
    %4 = vector.broadcast %3 : vector<1x128xf32> to vector<16x128xf32>
    %5 = arith.addf %2, %4 : vector<16x128xf32>
    %c0_5 = arith.constant 0 : index
    %c0_6 = arith.constant 0 : index
    %6 = vector.load %arg4[%c0_5, %c0_6] : memref<16x4xbf16, #tpu.memory_space<vmem>>, vector<16x4xbf16>
    %c0_7 = arith.constant 0 : index
    %c0_8 = arith.constant 0 : index
    %7 = vector.load %arg5[%c0_7, %c0_8] : memref<4x128xbf16, #tpu.memory_space<vmem>>, vector<4x128xbf16>
    %cst_9 = arith.constant dense<0.000000e+00> : vector<16x128xf32>
    %8 = tpu.matmul %6, %7, %cst_9 {dimension_numbers = #tpu.dot_dimension_numbers<[1], [0], [0], [1], [0, 0, 1, 1], [], []>} : vector<16x4xbf16>, vector<4x128xbf16>, vector<16x128xf32> -> vector<16x128xf32>
    %c4_i32 = arith.constant 4 : i32
    %9 = tpu.dynamic_rotate %5 by %c4_i32 dim 1 : vector<16x128xf32>, i32 -> vector<16x128xf32>
    %c124_i32 = arith.constant 124 : i32
    %10 = tpu.dynamic_rotate %5 by %c124_i32 dim 1 : vector<16x128xf32>, i32 -> vector<16x128xf32>
    %11 = arith.addf %9, %10 : vector<16x128xf32>
    %12 = tpu.iota {dimensions = array<i32: 1>} : vector<1x128xi32>
    %c4_i32_10 = arith.constant 4 : i32
    %13 = vector.broadcast %c4_i32_10 : i32 to vector<1x128xi32>
    %14 = arith.cmpi sge, %12, %13 : vector<1x128xi32>
    %c12_i32 = arith.constant 12 : i32
    %15 = vector.broadcast %c12_i32 : i32 to vector<1x128xi32>
    %16 = arith.cmpi slt, %12, %15 : vector<1x128xi32>
    %17 = arith.andi %14, %16 : vector<1x128xi1>
    %cst_11 = arith.constant 1.000000e+00 : f32
    %18 = vector.shape_cast %17 : vector<1x128xi1> to vector<1x128xi1>
    %19 = vector.broadcast %18 : vector<1x128xi1> to vector<16x128xi1>
    %20 = vector.broadcast %cst_11 : f32 to vector<16x128xf32>
    %21 = arith.select %19, %5, %20 : vector<16x128xi1>, vector<16x128xf32>
    %22 = math.log %21 : vector<16x128xf32>
    %23 = arith.mulf %11, %8 : vector<16x128xf32>
    %24 = arith.addf %5, %23 : vector<16x128xf32>
    %25 = arith.mulf %8, %8 : vector<16x128xf32>
    %cst_12 = arith.constant -5.000000e-01 : f32
    %26 = vector.broadcast %cst_12 : f32 to vector<16x128xf32>
    %27 = arith.mulf %26, %25 : vector<16x128xf32>
    %28 = arith.subf %27, %22 : vector<16x128xf32>
    %cst_13 = arith.constant 0.918938517 : f32
    %29 = vector.broadcast %cst_13 : f32 to vector<16x128xf32>
    %30 = arith.subf %28, %29 : vector<16x128xf32>
    %cst_14 = arith.constant 1.83787704 : f32
    %31 = vector.broadcast %cst_14 : f32 to vector<16x128xf32>
    %32 = arith.addf %31, %22 : vector<16x128xf32>
    %cst_15 = arith.constant 5.000000e-01 : f32
    %33 = vector.broadcast %cst_15 : f32 to vector<16x128xf32>
    %34 = arith.mulf %33, %32 : vector<16x128xf32>
    %cst_16 = arith.constant 5.000000e-01 : f32
    %35 = vector.broadcast %cst_16 : f32 to vector<16x128xf32>
    %36 = arith.addf %35, %34 : vector<16x128xf32>
    %c4_i32_17 = arith.constant 4 : i32
    %37 = vector.broadcast %c4_i32_17 : i32 to vector<1x128xi32>
    %38 = arith.cmpi slt, %12, %37 : vector<1x128xi32>
    %c8_i32 = arith.constant 8 : i32
    %39 = vector.broadcast %c8_i32 : i32 to vector<1x128xi32>
    %40 = arith.cmpi slt, %12, %39 : vector<1x128xi32>
    %c12_i32_18 = arith.constant 12 : i32
    %41 = vector.broadcast %c12_i32_18 : i32 to vector<1x128xi32>
    %42 = arith.cmpi slt, %12, %41 : vector<1x128xi32>
    %43 = vector.shape_cast %42 : vector<1x128xi1> to vector<1x128xi1>
    %44 = vector.broadcast %43 : vector<1x128xi1> to vector<16x128xi1>
    %45 = arith.select %44, %36, %24 : vector<16x128xi1>, vector<16x128xf32>
    %46 = vector.shape_cast %40 : vector<1x128xi1> to vector<1x128xi1>
    %47 = vector.broadcast %46 : vector<1x128xi1> to vector<16x128xi1>
    %48 = arith.select %47, %30, %45 : vector<16x128xi1>, vector<16x128xf32>
    %49 = vector.shape_cast %38 : vector<1x128xi1> to vector<1x128xi1>
    %50 = vector.broadcast %49 : vector<1x128xi1> to vector<16x128xi1>
    %51 = arith.select %50, %24, %48 : vector<16x128xi1>, vector<16x128xf32>
    %52 = arith.truncf %51 : vector<16x128xf32> to vector<16x128xbf16>
    %c0_19 = arith.constant 0 : index
    %c0_20 = arith.constant 0 : index
    %53 = vector.load %arg6[%c0_19, %c0_20] : memref<16x128xbf16, #tpu.memory_space<vmem>>, vector<16x128xbf16>
    tpu.vector_store %arg6[%c0_19, %c0_20], %52 {strides = array<i32>} : memref<16x128xbf16, #tpu.memory_space<vmem>>, vector<16x128xbf16>,
    return
  }
  func.func @transform_0(%arg0: i32) -> (i32, i32) {
    %c0_i32 = arith.constant 0 : i32
    %c0_i32_0 = arith.constant 0 : i32
    return %arg0, %c0_i32 : i32, i32
  }
  func.func @transform_1(%arg0: i32) -> (i32, i32) {
    %c0_i32 = arith.constant 0 : i32
    %c0_i32_0 = arith.constant 0 : i32
    %c0_i32_1 = arith.constant 0 : i32
    return %c0_i32, %c0_i32_0 : i32, i32
  }
  func.func @transform_2(%arg0: i32) -> (i32, i32) {
    %c0_i32 = arith.constant 0 : i32
    %c0_i32_0 = arith.constant 0 : i32
    %c0_i32_1 = arith.constant 0 : i32
    return %c0_i32, %c0_i32_0 : i32, i32
  }
  func.func @transform_3(%arg0: i32) -> (i32, i32) {
    %c0_i32 = arith.constant 0 : i32
    %c0_i32_0 = arith.constant 0 : i32
    return %arg0, %c0_i32 : i32, i32
  }
  func.func @transform_4(%arg0: i32) -> (i32, i32) {
    %c0_i32 = arith.constant 0 : i32
    %c0_i32_0 = arith.constant 0 : i32
    %c0_i32_1 = arith.constant 0 : i32
    return %c0_i32, %c0_i32_0 : i32, i32
  }
  func.func @transform_5(%arg0: i32) -> (i32, i32) {
    %c0_i32 = arith.constant 0 : i32
    %c0_i32_0 = arith.constant 0 : i32
    return %arg0, %c0_i32 : i32, i32
  }
}

</mosaic_0001>

<bundles_post_ra>
// kernel: tpu_custom_call.1
= control target key start
LH: loop header
LB: loop body
LE: loop exit
PB: predicated region body
PF: predicated region fallthrough
CT: control target
= control target key end

     0   :  { %10 = vsyncpa [#allocation3], 0  ;;  %s376_s0 = inlined_call_operand.vmem [shape: bf16[16,16], index: 0, kind: input, shape index: {}]   ;;  %s377_s1 = inlined_call_operand.hbm [shape: bf16[16,128], index: 1, kind: input, shape index: {}]   ;;  %s378_s2 = inlined_call_operand.hbm [shape: f32[1,128], index: 2, kind: input, shape index: {}]   ;;  %s379_s3 = inlined_call_operand.vmem [shape: bf16[16,4], index: 3, kind: input, shape index: {}]   ;;  %s380_s4 = inlined_call_operand.vmem [shape: bf16[4,128], index: 4, kind: input, shape index: {}]   ;;  %s381_s5 = inlined_call_operand.hbm [shape: bf16[16,128], index: 5, kind: output, shape index: {}]  }
   0x1   :  { %11 = vsyncpa [#allocation6], 0 }
   0x2   :  { %12 = vsyncpa [#allocation4], 0  ;;  %s19_s20 = sshll.u32 %s377_s1, 4  ;;  %s311_s21 = smov [#allocation2]   ;;  %s20_s20 = int_to_ptr.hbm [resolvable:$true] %s19_s20 }
   0x3   :  { %s21_s22 = sshll.u32 %s311_s21, 4  ;;  %s33_s25 = sshll.u32 %s378_s2, 4  ;;  %s22_s22 = int_to_ptr.vmem [resolvable:$true] %s21_s22  ;;  %s34_s25 = int_to_ptr.hbm [resolvable:$true] %s33_s25 }
   0x4   :  { %s312_s26 = smov 64   ;;  %s313_s27 = smov 4  }
   0x5   :  { %27 = dma.hbm_to_vmem [thread:$0]  %s20_s20, 128, %s22_s22, [#allocation3], %s312_s26, %s312_s26, %s313_s27  }
   0x6   :  { %s314_s28 = smov [#allocation5]  }
   0x7   :  { %s35_s29 = sshll.u32 %s314_s28, 4  ;;  %s36_s29 = int_to_ptr.vmem [resolvable:$true] %s35_s29 }
   0x8   :  { %38 = dma.hbm_to_vmem [thread:$0]  %s34_s25, 16, %s36_s29, [#allocation6]  }
   0x9   :  { %305 = dma.done.wait [#allocation3], 128  }
   0xa   :  { %306 = vsyncadd [#allocation3], 4294967168 }
   0xb   :  { %307 = dma.done.wait [#allocation6], 16  }
   0xc   :  { %308 = vsyncadd [#allocation6], 4294967280  ;;  %vm101_vm0 = vcmask 1041408   ;;  %v215_v0 = vld [vmem:[#allocation2] sm:$0xff]  ;;  %vm71_vm1 = vcmask 130048   ;;  %vm97_vm2 = vcmask 31744   ;;  %v129_v10 = vlaneseq }
   0xd   :  { %v91_v1 = vld [vmem:[%s380_s4] sm:$0x3]  ;;  %82 = vmatpush.bf16.msra.mxu0 %v215_v0  ;;  %v228_v5 = vld [vmem:[#allocation5] ss:$0 sm:$0xff]  ;;  %s315_s9 = smov 124   ;;  %s184_s11 = sshll.u32 %s381_s5, 4  ;;  %s185_s11 = int_to_ptr.hbm [resolvable:$true] %s184_s11 }
   0xe   :  { %v214_v2 = vld [vmem:[%s376_s0] sm:$0xff]  ;;  %v103_v3 = vsel %vm101_vm0, %v91_v1, 0  ;;  %v130_v11 = vand.u32 127, %v129_v10  ;;  %s316_s0 = smov [#allocation7]  }
   0xf   :  { %v216_v4 = vld [vmem:[%s379_s3] sm:$0xff]  ;;  %112 = vmatpush.bf16.msra.mxu1 %v103_v3  ;;  %s182_s3 = sshll.u32 %s316_s0, 4  ;;  %s183_s3 = int_to_ptr.vmem [resolvable:$true] %s182_s3 }
  0x10   :  { %206 = vmatmul.msk.bf16.vlgmr.msra.gmra.mxu0 %vm71_vm1, %v214_v2  ;;  %vm131_vm3 = vcmp.ge.s32.totalorder %v130_v11, 4  ;;  %vm132_vm4 = vcmp.lt.s32.totalorder %v130_v11, 12  ;;  %vm161_vm6 = vcmp.lt.s32.totalorder %v130_v11, 8  ;;  %vm160_vm7 = vcmp.lt.s32.totalorder %v130_v11, 4 }
  0x11   :  { %vm133_vm5 = vmand %vm131_vm3, %vm132_vm4 }
  0x12   :  { %211 = vmatmul.msk.bf16.vlgmr.msra.gmra.mxu1 %vm97_vm2, %v216_v4 }
  0x8d   :  { %v84_v6 = vpop.f32.mrf.mxu0 }
  0x8e   :  { %v85_v7 = vadd.f32 %v228_v5, %v84_v6 }
  0x8f   :  { %v114_v13 = vpop.f32.mrf.mxu1 }
  0x90   :  { %123 = vrot.lane.b32.xlu1 %v85_v7, %s315_s9  ;;  %119 = vrot.lane.b32.xlu0 %v85_v7, %s313_s27  ;;  %v136_v12 = vsel %vm133_vm5, %v85_v7, 1.0  ;;  %v146_v19 = vmul.f32 %v114_v13, %v114_v13 }
  0x91   :  { %229 = vlog2.f32 %v136_v12 }
  0x92   :  { %v148_v27 = vmul.f32 -0.5, %v146_v19 }
  0x95   :  { %v86_v8 = vpop.f32.mrf.mxu0 }
  0x96   :  { %v87_v9 = vadd.f32 %v228_v5, %v86_v8 }
  0x97   :  { %v230_v15 = vpop.eup %229  ;;  %v116_v18 = vpop.f32.mrf.mxu1 }
  0x98   :  { %125 = vrot.lane.b32.xlu1 %v87_v9, %s315_s9  ;;  %121 = vrot.lane.b32.xlu0 %v87_v9, %s313_s27  ;;  %v137_v14 = vsel %vm133_vm5, %v87_v9, 1.0  ;;  %v139_v16 = vmul.f32 0.6931472, %v230_v15  ;;  %v147_v25 = vmul.f32 %v116_v18, %v116_v18 }
  0x99   :  { %231 = vlog2.f32 %v137_v14 }
  0x9a   :  { %v154_v22 = vadd.f32 1.837877, %v139_v16  ;;  %v149_v30 = vmul.f32 -0.5, %v147_v25  ;;  %v150_v32 = vsub.f32 %v148_v27, %v139_v16 }
  0x9c   :  { %v156_v28 = vmul.f32 0.5, %v154_v22  ;;  %v212_v41 = vadd.f32 -0.9189385, %v150_v32 }
  0x9e   :  { %v158_v35 = vadd.f32 0.5, %v156_v28 }
  0x9f   :  { %v232_v17 = vpop.eup %231 }
  0xa0   :  { %v141_v23 = vmul.f32 0.6931472, %v232_v17 }
  0xa2   :  { %v155_v29 = vadd.f32 1.837877, %v141_v23  ;;  %v151_v38 = vsub.f32 %v149_v30, %v141_v23 }
  0xa4   :  { %v157_v36 = vmul.f32 0.5, %v155_v29  ;;  %v213_v44 = vadd.f32 -0.9189385, %v151_v38 }
  0xa6   :  { %v159_v42 = vadd.f32 0.5, %v157_v36 }
 0x102   :  { %v124_v20 = vpop.permute.xlu1 %123  ;;  %v120_v21 = vpop.permute.xlu0 %119 }
 0x103   :  { %v127_v24 = vadd.f32 %v124_v20, %v120_v21 }
 0x105   :  { %v142_v26 = vmul.f32 %v127_v24, %v114_v13 }
 0x107   :  { %v144_v31 = vadd.f32 %v142_v26, %v85_v7 }
 0x109   :  { %v164_v39 = vsel %vm132_vm4, %v158_v35, %v144_v31 }
 0x10a   :  { %v126_v33 = vpop.permute.xlu1 %125  ;;  %v122_v34 = vpop.permute.xlu0 %121  ;;  %v168_v45 = vsel %vm161_vm6, %v212_v41, %v164_v39 }
 0x10b   :  { %v128_v37 = vadd.f32 %v126_v33, %v122_v34  ;;  %v172_v48 = vsel %vm160_vm7, %v144_v31, %v168_v45 }
 0x10d   :  { %v143_v40 = vmul.f32 %v128_v37, %v116_v18 }
 0x10f   :  { %v145_v43 = vadd.f32 %v143_v40, %v87_v9 }
 0x111   :  { %v165_v46 = vsel %vm132_vm4, %v159_v42, %v145_v43 }
 0x112   :  { %v169_v47 = vsel %vm161_vm6, %v213_v44, %v165_v46 }
 0x113   :  { %v173_v49 = vsel %vm160_vm7, %v145_v43, %v169_v47 }
 0x114   :  { %v220_v50 = vpack.c.bf16 %v173_v49, %v172_v48 }
 0x116   :  { %221 = vst [vmem:[#allocation7] sm:$0xff] %v220_v50  }
 0x117   :  { %190 = dma.vmem_to_hbm [thread:$0]  %s183_s3, 128, %s185_s11, [#allocation4], %s312_s26, %s312_s26, %s313_s27  }
 0x118   :  { %309 = dma.done.wait [#allocation4], 128  }
 0x119   :  { %310 = vsyncadd [#allocation4], 4294967168 }
 0x11a   :  { %195 = vsyncpa [#allocation3], 1 }
 0x11b   :  { %196 = vsyncpa [#allocation6], 1 }
 0x11c   :  { %197 = vsyncpa [#allocation4], 1 }

</bundles_post_ra>
